<compile_context>
chip_gen: v6e
topology: v6e:2x2x1
jax: 0.10.0
libtpu: 0.0.40
codegen_flags: <defaults>
</compile_context>

<pallas_src>
import jax
import jax.numpy as jnp
from jax import lax
from jax.experimental import pallas as pl
from jax.experimental.pallas import tpu as pltpu


# Contract last dim of both operands: x[B,K] . w[N,K] -> [B,N]  (== x @ w.T,
# i.e. PyTorch F.linear) — no transpose materialized inside the kernel.
_LINEAR_DNUMS = (((1,), (1,)), ((), ()))


def bnn_alpha_kernel(x_ref, mu1_ref, rho1_ref, eps1_ref,
                     mu2_ref, rho2_ref, eps2_ref, o_ref):
    # ---- Layer 1: sample w1 (reparameterization), then relu(F.linear(x, w1))
    w1 = mu1_ref[...] + jax.nn.softplus(rho1_ref[...]) * eps1_ref[...]   # [H, Din]
    h = lax.dot_general(x_ref[...], w1, dimension_numbers=_LINEAR_DNUMS,
                        preferred_element_type=jnp.float32)              # [B, H]
    h = jnp.maximum(h, 0.0)

    # ---- Layer 2: sample w2, then sigmoid(F.linear(h, w2))
    w2 = mu2_ref[...] + jax.nn.softplus(rho2_ref[...]) * eps2_ref[...]   # [O, H]
    z = lax.dot_general(h, w2, dimension_numbers=_LINEAR_DNUMS,
                        preferred_element_type=jnp.float32)              # [B, O]
    o_ref[...] = jax.nn.sigmoid(z)


@jax.jit
def bnn_alpha_forward(x, mu1, rho1, eps1, mu2, rho2, eps2):
    """BNN_Alpha forward, batched over S Monte-Carlo weight draws.

      x:         [B, Din]
      mu1/rho1:  [H, Din]     eps1: [S, H, Din]
      mu2/rho2:  [O, H]       eps2: [S, O, H]
      returns:   [S, B, O]    (S=1 reproduces a single nn.Module forward)
    """
    B, _ = x.shape
    S, H, Din = eps1.shape
    O = eps2.shape[1]

    # Full-array blocks (block_shape == array dims satisfies the (8,128) rule);
    # parameters and x are resident across grid steps, eps is per-sample.
    def resident(shape):
        return pl.BlockSpec(shape, lambda s: (0, 0))

    def per_sample(shape):
        return pl.BlockSpec((None,) + shape, lambda s: (s, 0, 0))

    return pl.pallas_call(
        bnn_alpha_kernel,
        out_shape=jax.ShapeDtypeStruct((S, B, O), jnp.float32),
        grid=(S,),
        in_specs=[
            resident((B, Din)),      # x
            resident((H, Din)),      # mu1
            resident((H, Din)),      # rho1
            per_sample((H, Din)),    # eps1 — one draw per grid step
            resident((O, H)),        # mu2
            resident((O, H)),        # rho2
            per_sample((O, H)),      # eps2
        ],
        out_specs=per_sample((B, O)),
        compiler_params=pltpu.CompilerParams(
            dimension_semantics=("parallel",)),
    )(x, mu1, rho1, eps1, mu2, rho2, eps2)


def reference_forward(x, mu1, rho1, eps1, mu2, rho2, eps2):
    w1 = mu1[None] + jax.nn.softplus(rho1)[None] * eps1            # [S, H, Din]
    h = jnp.maximum(jnp.einsum('bd,shd->sbh', x, w1), 0.0)         # [S, B, H]
    w2 = mu2[None] + jax.nn.softplus(rho2)[None] * eps2            # [S, O, H]
    return jax.nn.sigmoid(jnp.einsum('sbh,soh->sbo', h, w2))       # [S, B, O]


if __name__ == "__main__":
    # Small shapes consistent with BNN_Alpha(input_dim, hidden_dim, output_dim).
    B, input_dim, hidden_dim, output_dim = 8, 16, 32, 4
    S = 4  # Monte-Carlo weight draws fused into one gridded kernel call

    key = jax.random.PRNGKey(0)
    kx, kmu1, krho1, keps1, kmu2, krho2, keps2 = jax.random.split(key, 7)

    x = jax.random.normal(kx, (B, input_dim), dtype=jnp.float32)

    # Parameter init mirroring the PyTorch __init__:
    #   mu = randn(out, in) * 0.1 ; rho = randn(out, in) * -3.0
    mu1 = jax.random.normal(kmu1, (hidden_dim, input_dim), jnp.float32) * 0.1
    rho1 = jax.random.normal(krho1, (hidden_dim, input_dim), jnp.float32) * -3.0
    mu2 = jax.random.normal(kmu2, (output_dim, hidden_dim), jnp.float32) * 0.1
    rho2 = jax.random.normal(krho2, (output_dim, hidden_dim), jnp.float32) * -3.0

    # Reparameterization noise (one independent draw per sample), host-side so
    # the kernel is deterministic given its inputs.
    eps1 = jax.random.normal(keps1, (S, hidden_dim, input_dim), jnp.float32)
    eps2 = jax.random.normal(keps2, (S, output_dim, hidden_dim), jnp.float32)

    out = jax.block_until_ready(
        bnn_alpha_forward(x, mu1, rho1, eps1, mu2, rho2, eps2))

    ref = reference_forward(x, mu1, rho1, eps1, mu2, rho2, eps2)
    assert out.shape == (S, B, output_dim)
    assert jnp.allclose(out, ref, atol=1e-5, rtol=1e-5), "mismatch vs reference"

    print("KERNEL_OK")
</pallas_src>

<mosaic_0001>
module attributes {stable_mosaic.version = 11 : i64} {
  func.func @bnn_alpha_kernel(%arg0: i32, %arg1: memref<8x16xf32, #tpu.memory_space<vmem>>, %arg2: memref<32x16xf32, #tpu.memory_space<vmem>>, %arg3: memref<32x16xf32, #tpu.memory_space<vmem>>, %arg4: memref<1x32x16xf32, #tpu.memory_space<vmem>>, %arg5: memref<4x32xf32, #tpu.memory_space<vmem>>, %arg6: memref<4x32xf32, #tpu.memory_space<vmem>>, %arg7: memref<1x4x32xf32, #tpu.memory_space<vmem>>, %arg8: memref<1x8x4xf32, #tpu.memory_space<vmem>>) attributes {dimension_semantics = [#tpu.dimension_semantics<parallel>], iteration_bounds = array<i64: 4>, scalar_prefetch = 0 : i64, scratch_operands = 0 : i64, tpu.core_type = #tpu.core_type<tc>, window_params = [{pipeline_mode = #tpu.pipeline_mode<synchronous>, transform_indices = @transform_0, window_bounds = array<i64: 8, 16>}, {pipeline_mode = #tpu.pipeline_mode<synchronous>, transform_indices = @transform_1, window_bounds = array<i64: 32, 16>}, {pipeline_mode = #tpu.pipeline_mode<synchronous>, transform_indices = @transform_2, window_bounds = array<i64: 32, 16>}, {transform_indices = @transform_3, window_bounds = array<i64: 1, 32, 16>}, {pipeline_mode = #tpu.pipeline_mode<synchronous>, transform_indices = @transform_4, window_bounds = array<i64: 4, 32>}, {pipeline_mode = #tpu.pipeline_mode<synchronous>, transform_indices = @transform_5, window_bounds = array<i64: 4, 32>}, {transform_indices = @transform_6, window_bounds = array<i64: 1, 4, 32>}, {transform_indices = @transform_7, window_bounds = array<i64: 1, 8, 4>}]} {
    %c0 = arith.constant 0 : index
    %c0_0 = arith.constant 0 : index
    %0 = vector.load %arg2[%c0, %c0_0] : memref<32x16xf32, #tpu.memory_space<vmem>>, vector<32x16xf32>
    %c0_1 = arith.constant 0 : index
    %c0_2 = arith.constant 0 : index
    %1 = vector.load %arg3[%c0_1, %c0_2] : memref<32x16xf32, #tpu.memory_space<vmem>>, vector<32x16xf32>
    %cst = arith.constant 0.000000e+00 : f32
    %2 = vector.broadcast %cst : f32 to vector<32x16xf32>
    %3 = arith.maximumf %1, %2 : vector<32x16xf32>
    %4 = vector.broadcast %cst : f32 to vector<32x16xf32>
    %5 = arith.subf %1, %4 : vector<32x16xf32>
    %6 = arith.cmpf one, %5, %5 : vector<32x16xf32>
    %7 = vector.broadcast %cst : f32 to vector<32x16xf32>
    %8 = arith.addf %1, %7 : vector<32x16xf32>
    %9 = math.absf %5 : vector<32x16xf32>
    %cst_3 = arith.constant 0.000000e+00 : f32
    %10 = vector.broadcast %cst_3 : f32 to vector<32x16xf32>
    %11 = arith.subf %10, %9 : vector<32x16xf32>
    %12 = math.exp %11 : vector<32x16xf32>
    %13 = math.log1p %12 : vector<32x16xf32>
    %14 = arith.addf %3, %13 : vector<32x16xf32>
    %15 = arith.select %6, %8, %14 : vector<32x16xi1>, vector<32x16xf32>
    %c0_4 = arith.constant 0 : index
    %c0_5 = arith.constant 0 : index
    %c0_6 = arith.constant 0 : index
    %16 = vector.load %arg4[%c0_4, %c0_5, %c0_6] : memref<1x32x16xf32, #tpu.memory_space<vmem>>, vector<1x32x16xf32>
    %17 = vector.shape_cast %16 : vector<1x32x16xf32> to vector<32x16xf32>
    %18 = arith.mulf %15, %17 : vector<32x16xf32>
    %19 = arith.addf %0, %18 : vector<32x16xf32>
    %c0_7 = arith.constant 0 : index
    %c0_8 = arith.constant 0 : index
    %20 = vector.load %arg1[%c0_7, %c0_8] : memref<8x16xf32, #tpu.memory_space<vmem>>, vector<8x16xf32>
    %cst_9 = arith.constant dense<0.000000e+00> : vector<8x32xf32>
    %21 = tpu.matmul %20, %19, %cst_9 {dimension_numbers = #tpu.dot_dimension_numbers<[1], [1], [0], [0], [0, 0, 1, 0], [], []>} : vector<8x16xf32>, vector<32x16xf32>, vector<8x32xf32> -> vector<8x32xf32>
    %cst_10 = arith.constant 0.000000e+00 : f32
    %22 = vector.broadcast %cst_10 : f32 to vector<8x32xf32>
    %23 = arith.maximumf %21, %22 : vector<8x32xf32>
    %c0_11 = arith.constant 0 : index
    %c0_12 = arith.constant 0 : index
    %24 = vector.load %arg5[%c0_11, %c0_12] : memref<4x32xf32, #tpu.memory_space<vmem>>, vector<4x32xf32>
    %c0_13 = arith.constant 0 : index
    %c0_14 = arith.constant 0 : index
    %25 = vector.load %arg6[%c0_13, %c0_14] : memref<4x32xf32, #tpu.memory_space<vmem>>, vector<4x32xf32>
    %cst_15 = arith.constant 0.000000e+00 : f32
    %26 = vector.broadcast %cst_15 : f32 to vector<4x32xf32>
    %27 = arith.maximumf %25, %26 : vector<4x32xf32>
    %28 = vector.broadcast %cst_15 : f32 to vector<4x32xf32>
    %29 = arith.subf %25, %28 : vector<4x32xf32>
    %30 = arith.cmpf one, %29, %29 : vector<4x32xf32>
    %31 = vector.broadcast %cst_15 : f32 to vector<4x32xf32>
    %32 = arith.addf %25, %31 : vector<4x32xf32>
    %33 = math.absf %29 : vector<4x32xf32>
    %cst_16 = arith.constant 0.000000e+00 : f32
    %34 = vector.broadcast %cst_16 : f32 to vector<4x32xf32>
    %35 = arith.subf %34, %33 : vector<4x32xf32>
    %36 = math.exp %35 : vector<4x32xf32>
    %37 = math.log1p %36 : vector<4x32xf32>
    %38 = arith.addf %27, %37 : vector<4x32xf32>
    %39 = arith.select %30, %32, %38 : vector<4x32xi1>, vector<4x32xf32>
    %c0_17 = arith.constant 0 : index
    %c0_18 = arith.constant 0 : index
    %c0_19 = arith.constant 0 : index
    %40 = vector.load %arg7[%c0_17, %c0_18, %c0_19] : memref<1x4x32xf32, #tpu.memory_space<vmem>>, vector<1x4x32xf32>
    %41 = vector.shape_cast %40 : vector<1x4x32xf32> to vector<4x32xf32>
    %42 = arith.mulf %39, %41 : vector<4x32xf32>
    %43 = arith.addf %24, %42 : vector<4x32xf32>
    %cst_20 = arith.constant dense<0.000000e+00> : vector<8x4xf32>
    %44 = tpu.matmul %23, %43, %cst_20 {dimension_numbers = #tpu.dot_dimension_numbers<[1], [1], [0], [0], [0, 0, 1, 0], [], []>} : vector<8x32xf32>, vector<4x32xf32>, vector<8x4xf32> -> vector<8x4xf32>
    %45 = arith.negf %44 : vector<8x4xf32>
    %46 = math.exp %45 : vector<8x4xf32>
    %cst_21 = arith.constant 1.000000e+00 : f32
    %47 = vector.broadcast %cst_21 : f32 to vector<8x4xf32>
    %48 = arith.addf %47, %46 : vector<8x4xf32>
    %49 = arith.divf %47, %48 : vector<8x4xf32>
    %c0_22 = arith.constant 0 : index
    %c0_23 = arith.constant 0 : index
    %c0_24 = arith.constant 0 : index
    %50 = vector.load %arg8[%c0_22, %c0_23, %c0_24] : memref<1x8x4xf32, #tpu.memory_space<vmem>>, vector<1x8x4xf32>
    %51 = vector.shape_cast %50 : vector<1x8x4xf32> to vector<8x4xf32>
    %52 = vector.shape_cast %49 : vector<8x4xf32> to vector<1x8x4xf32>
    tpu.vector_store %arg8[%c0_22, %c0_23, %c0_24], %52 {strides = array<i32>} : memref<1x8x4xf32, #tpu.memory_space<vmem>>, vector<1x8x4xf32>,
    return
  }
  func.func @transform_0(%arg0: i32) -> (i32, i32) {
    %c0_i32 = arith.constant 0 : i32
    %c0_i32_0 = arith.constant 0 : i32
    %c0_i32_1 = arith.constant 0 : i32
    return %c0_i32, %c0_i32_0 : i32, i32
  }
  func.func @transform_1(%arg0: i32) -> (i32, i32) {
    %c0_i32 = arith.constant 0 : i32
    %c0_i32_0 = arith.constant 0 : i32
    %c0_i32_1 = arith.constant 0 : i32
    return %c0_i32, %c0_i32_0 : i32, i32
  }
  func.func @transform_2(%arg0: i32) -> (i32, i32) {
    %c0_i32 = arith.constant 0 : i32
    %c0_i32_0 = arith.constant 0 : i32
    %c0_i32_1 = arith.constant 0 : i32
    return %c0_i32, %c0_i32_0 : i32, i32
  }
  func.func @transform_3(%arg0: i32) -> (i32, i32, i32) {
    %c0_i32 = arith.constant 0 : i32
    %c0_i32_0 = arith.constant 0 : i32
    %c0_i32_1 = arith.constant 0 : i32
    return %arg0, %c0_i32, %c0_i32_0 : i32, i32, i32
  }
  func.func @transform_4(%arg0: i32) -> (i32, i32) {
    %c0_i32 = arith.constant 0 : i32
    %c0_i32_0 = arith.constant 0 : i32
    %c0_i32_1 = arith.constant 0 : i32
    return %c0_i32, %c0_i32_0 : i32, i32
  }
  func.func @transform_5(%arg0: i32) -> (i32, i32) {
    %c0_i32 = arith.constant 0 : i32
    %c0_i32_0 = arith.constant 0 : i32
    %c0_i32_1 = arith.constant 0 : i32
    return %c0_i32, %c0_i32_0 : i32, i32
  }
  func.func @transform_6(%arg0: i32) -> (i32, i32, i32) {
    %c0_i32 = arith.constant 0 : i32
    %c0_i32_0 = arith.constant 0 : i32
    %c0_i32_1 = arith.constant 0 : i32
    return %arg0, %c0_i32, %c0_i32_0 : i32, i32, i32
  }
  func.func @transform_7(%arg0: i32) -> (i32, i32, i32) {
    %c0_i32 = arith.constant 0 : i32
    %c0_i32_0 = arith.constant 0 : i32
    %c0_i32_1 = arith.constant 0 : i32
    return %arg0, %c0_i32, %c0_i32_0 : i32, i32, i32
  }
}

</mosaic_0001>

<bundles_post_ra>
// kernel: bnn_alpha_forward.1
= control target key start
LH: loop header
LB: loop body
LE: loop exit
PB: predicated region body
PF: predicated region fallthrough
CT: control target
= control target key end

     0   :  { %s774_s24 = smov 0   ;;  %s912_s0 = inlined_call_operand.vmem [shape: f32[8,16], index: 0, kind: input, shape index: {}]   ;;  %s913_s1 = inlined_call_operand.vmem [shape: f32[32,16], index: 1, kind: input, shape index: {}]   ;;  %s914_s2 = inlined_call_operand.vmem [shape: f32[32,16], index: 2, kind: input, shape index: {}]   ;;  %s915_s3 = inlined_call_operand.vmem [shape: f32[4,32,16], index: 3, kind: input, shape index: {}]   ;;  %s916_s4 = inlined_call_operand.vmem [shape: f32[4,32], index: 4, kind: input, shape index: {}]   ;;  %s917_s5 = inlined_call_operand.vmem [shape: f32[4,32], index: 5, kind: input, shape index: {}]   ;;  %s918_s6 = inlined_call_operand.vmem [shape: f32[4,4,32], index: 6, kind: input, shape index: {}]   ;;  %s919_s7 = inlined_call_operand.vmem [shape: f32[4,8,4], index: 7, kind: output, shape index: {}]  }
   0x1 LB: > { %s647_s25 = sadd.s32 4294967295, %s730_s24   ;;  %p651_p0 = scmp.ge.s32.totalorder %s730_s24, 1  ;;  %s730_s24 = sphi %s774_s24, %s17_s24  }
   0x2   : > { %p246_p1 = scmp.lt.s32.totalorder %s730_s24, 5 }
   0x4   : > { %p247_p2 = pnand %p651_p0, %p246_p1 }
   0x5   : > { %p281_p3 = scmp.lt.s32.totalorder (!%p247_p2), %s647_s25, 3 }
   0x6   : > { %250 = sbr.rel (%p247_p2) target bundleno = 494 (0x1ee), region = 48 }
   0xb   : > { %v785_v0 = vld [vmem:[%s914_s2 + $0x18] sm:$0xff]  ;;  %v732_v1 = vmov 0.0   ;;  %v792_v3 = vld [vmem:[%s914_s2 + $0x10] sm:$0xff]  ;;  %v797_v4 = vld [vmem:[%s914_s2 + $0x8] sm:$0xff]  ;;  %vm733_vm0 = vmmov 0   ;;  %s929_s25 = smov (!%p281_p3, %s647_s25), 3 }
   0xc   : > { %674 = vmatprep.subr.mxu0 %v732_v1  ;;  %v317_v2 = vand.u32 2147483647, %v785_v0  ;;  %685 = vmatprep.subr.mxu1 %v732_v1  ;;  %v316_v5 = vand.u32 2147483647, %v792_v3  ;;  %v315_v7 = vand.u32 2147483647, %v797_v4  ;;  %vm309_vm3 = vcmp.ne.f32.partialorder %v785_v0, %v785_v0 }
   0xd   : > { %v805_v8 = vld [vmem:[%s914_s2] sm:$0xff]  ;;  %682 = vmatprep.mubr.msk.f32.mxu0 %vm733_vm0, %v732_v1  ;;  %687 = vmatprep.mubr.msk.f32.mxu1 %vm733_vm0, %v732_v1  ;;  %s666_s11 = sshll.u32 %s929_s25, 5  ;;  %v305_v38 = vmax.f32 %v785_v0, 0.0  ;;  %v304_v44 = vmax.f32 %v792_v3, 0.0  ;;  %v303_v49 = vmax.f32 %v797_v4, 0.0  ;;  %vm308_vm5 = vcmp.ne.f32.partialorder %v792_v3, %v792_v3  ;;  %s654_s29 = sshll.u32 %s929_s25, 2 }
   0xe   : > { %v321_v6 = vsub.f32 0.0, %v317_v2  ;;  %v320_v9 = vsub.f32 0.0, %v316_v5  ;;  %v314_v10 = vand.u32 2147483647, %v805_v8  ;;  %v319_v12 = vsub.f32 0.0, %v315_v7  ;;  %s825_s14 = scalar_lea.vmem %s915_s3, %s666_s11  ;;  %v297_v2 = vld [vmem:[%s913_s1 + $0x18] sm:$0xff]  ;;  %s289_s9 = scalar_lea.vmem %s918_s6, %s654_s29 }
   0xf   : > { %v377_v56 = vld [vmem:[%s825_s14 + $0x18] sm:$0xff]  ;;  %v302_v58 = vmax.f32 %v805_v8, 0.0  ;;  %v376_v61 = vld [vmem:[%s825_s14 + $0x10] sm:$0xff]  ;;  %vm307_vm7 = vcmp.ne.f32.partialorder %v797_v4, %v797_v4  ;;  %vm387_vm8 = vcmask 130048   ;;  %vm306_vm9 = vcmp.ne.f32.partialorder %v805_v8, %v805_v8  ;;  %s655_s12 = sshll.u32 %s929_s25, 3 }
  0x10   : > { %v328_v11 = vmul.f32 1.442695, %v321_v6  ;;  %v326_v13 = vmul.f32 1.442695, %v320_v9  ;;  %v318_v14 = vsub.f32 0.0, %v314_v10  ;;  %vm497_vm12 = vcmask 261120   ;;  %s293_s15 = scalar_lea.vmem %s919_s7, %s655_s12 }
  0x11   : > { %v324_v15 = vmul.f32 1.442695, %v319_v12  ;;  %vm580_vm13 = vcmask 31744  }
  0x12   : > { %700 = vpow2.f32 %v328_v11  ;;  %v322_v16 = vmul.f32 1.442695, %v318_v14  ;;  %v296_v11 = vld [vmem:[%s913_s1 + $0x10] sm:$0xff] }
  0x13   : > { %702 = vpow2.f32 %v326_v13 }
  0x14   : > { %704 = vpow2.f32 %v324_v15 }
  0x15   : > { %706 = vpow2.f32 %v322_v16 }
  0x1f   : > { %v701_v17 = vpop.eup %700 }
  0x20   : > { %v703_v18 = vpop.eup %702  ;;  %v357_v19 = vadd.f32 1.0, %v701_v17  ;;  %v360_v25 = vmul.f32 -0.5, %v701_v17  ;;  %v363_v30 = vand.u32 2147483647, %v701_v17 }
  0x21   : > { %v705_v20 = vpop.eup %704  ;;  %v348_v21 = vadd.f32 1.0, %v703_v18  ;;  %v351_v26 = vmul.f32 -0.5, %v703_v18  ;;  %v354_v32 = vand.u32 2147483647, %v703_v18 }
  0x22   : > { %v707_v22 = vpop.eup %706  ;;  %708 = vlog2.f32 %v357_v19  ;;  %v339_v23 = vadd.f32 1.0, %v705_v20  ;;  %v342_v27 = vmul.f32 -0.5, %v705_v20  ;;  %v361_v28 = vadd.f32 1.0, %v360_v25  ;;  %v374_v19 = vld [vmem:[%s825_s14] sm:$0xff] }
  0x23   : > { %710 = vlog2.f32 %v348_v21  ;;  %v330_v24 = vadd.f32 1.0, %v707_v22  ;;  %v333_v29 = vmul.f32 -0.5, %v707_v22  ;;  %v352_v31 = vadd.f32 1.0, %v351_v26  ;;  %v294_v21 = vld [vmem:[%s913_s1] sm:$0xff] }
  0x24   : > { %712 = vlog2.f32 %v339_v23  ;;  %v343_v33 = vadd.f32 1.0, %v342_v27  ;;  %v345_v34 = vand.u32 2147483647, %v705_v20  ;;  %v362_v35 = vmul.f32 %v701_v17, %v361_v28  ;;  %v295_v17 = vld [vmem:[%s913_s1 + $0x8] sm:$0xff]  ;;  %v475_v23 = vld [vmem:[%s917_s5] sm:$0xf] }
  0x25   : > { %714 = vlog2.f32 %v330_v24  ;;  %v334_v36 = vadd.f32 1.0, %v333_v29  ;;  %vm818_vm1 = vcmp.lt.f32.partialorder %v363_v30, 0.0004427343  ;;  %v353_v40 = vmul.f32 %v703_v18, %v352_v31 }
  0x26   : > { %v336_v41 = vand.u32 2147483647, %v707_v22  ;;  %vm828_vm2 = vcmp.lt.f32.partialorder %v354_v32, 0.0004427343  ;;  %v344_v46 = vmul.f32 %v705_v20, %v343_v33  ;;  %vm835_vm4 = vcmp.lt.f32.partialorder %v345_v34, 0.0004427343 }
  0x27   : > { %v335_v53 = vmul.f32 %v707_v22, %v334_v36  ;;  %v479_v24 = vand.u32 2147483647, %v475_v23  ;;  %v476_v34 = vmax.f32 %v475_v23, 0.0  ;;  %vm477_vm11 = vcmp.ne.f32.partialorder %v475_v23, %v475_v23 }
  0x28   : > { %vm847_vm6 = vcmp.lt.f32.partialorder %v336_v41, 0.0004427343 }
  0x29   : > { %v480_v25 = vsub.f32 0.0, %v479_v24 }
  0x2b   : > { %v481_v26 = vmul.f32 1.442695, %v480_v25 }
  0x2d   : > { %716 = vpow2.f32 %v481_v26 }
  0x2f   : > { %v709_v37 = vpop.eup %708 }
  0x30   : > { %v711_v42 = vpop.eup %710  ;;  %v359_v43 = vmul.f32 0.6931472, %v709_v37 }
  0x31   : > { %v713_v47 = vpop.eup %712  ;;  %v350_v48 = vmul.f32 0.6931472, %v711_v42 }
  0x32   : > { %v365_v51 = vsel %vm818_vm1, %v362_v35, %v359_v43  ;;  %v341_v52 = vmul.f32 0.6931472, %v713_v47  ;;  %v715_v54 = vpop.eup %714 }
  0x33   : > { %v369_v55 = vadd.f32 %v365_v51, %v305_v38  ;;  %v356_v57 = vsel %vm828_vm2, %v353_v40, %v350_v48  ;;  %v332_v63 = vmul.f32 0.6931472, %v715_v54  ;;  %v494_v38 = vld [vmem:[%s289_s9] sm:$0xf] }
  0x34   : > { %v368_v60 = vadd.f32 %v356_v57, %v304_v44  ;;  %v347_v62 = vsel %vm835_vm4, %v344_v46, %v341_v52  ;;  %v474_v40 = vld [vmem:[%s916_s4] sm:$0xf] }
  0x35   : > { %v373_v5 = vsel %vm309_vm3, %v785_v0, %v369_v55  ;;  %v367_v6 = vadd.f32 %v347_v62, %v303_v49  ;;  %v338_v10 = vsel %vm847_vm6, %v335_v53, %v332_v63  ;;  %v375_v0 = vld [vmem:[%s825_s14 + $0x8] sm:$0xff] }
  0x36   : > { %v381_v7 = vmul.f32 %v377_v56, %v373_v5  ;;  %v372_v9 = vsel %vm308_vm5, %v792_v3, %v368_v60  ;;  %v366_v14 = vadd.f32 %v338_v10, %v302_v58 }
  0x37   : > { %v380_v12 = vmul.f32 %v376_v61, %v372_v9  ;;  %v371_v13 = vsel %vm307_vm7, %v797_v4, %v367_v6 }
  0x38   : > { %v385_v15 = vadd.f32 %v381_v7, %v297_v2  ;;  %v379_v16 = vmul.f32 %v375_v0, %v371_v13  ;;  %v370_v18 = vsel %vm306_vm9, %v805_v8, %v366_v14  ;;  %v386_v8 = vld [vmem:[%s912_s0] sm:$0xff] }
  0x39   : > { %v384_v3 = vadd.f32 %v380_v12, %v296_v11  ;;  %v378_v20 = vmul.f32 %v374_v19, %v370_v18 }
  0x3a   : > { %675 = vmatpush3.xpose.msk.msra.mxu0 %vm387_vm8, %v385_v15  ;;  %v383_v4 = vadd.f32 %v379_v16, %v295_v17  ;;  %v717_v27 = vpop.eup %716 }
  0x3b   : > { %676 = vmatprep.subr.mxu0 %v732_v1  ;;  %v382_v22 = vadd.f32 %v378_v20, %v294_v21  ;;  %v483_v28 = vadd.f32 1.0, %v717_v27  ;;  %v489_v31 = vand.u32 2147483647, %v717_v27 }
  0x3d   : > { %718 = vlog2.f32 %v483_v28  ;;  %vm490_vm10 = vcmp.lt.f32.partialorder %v489_v31, 0.0004427343 }
  0x3e   : > { %677 = vmatpush3.xpose.msk.msra.mxu0 %vm387_vm8, %v384_v3 }
  0x3f   : > { %678 = vmatprep.subr.mxu0 %v732_v1 }
  0x42   : > { %679 = vmatpush3.xpose.msk.msra.mxu0 %vm387_vm8, %v383_v4 }
  0x43   : > { %680 = vmatprep.subr.mxu0 %v732_v1  ;;  %v486_v1 = vmul.f32 -0.5, %v717_v27 }
  0x45   : > { %v487_v29 = vadd.f32 1.0, %v486_v1 }
  0x46   : > { %681 = vmatpush3.xpose.msk.msra.mxu0 %vm387_vm8, %v382_v22 }
  0x47   : > { %v488_v33 = vmul.f32 %v717_v27, %v487_v29 }
  0x49   : > { %683 = vmatmul.mubr.msk.f32.vlgmr.msra.gmra.mxu0 %vm387_vm8, %v386_v8 }
  0x4a   : > { %v719_v30 = vpop.eup %718 }
  0x4b   : > { %v485_v32 = vmul.f32 0.6931472, %v719_v30 }
  0x4d   : > { %v491_v35 = vsel %vm490_vm10, %v488_v33, %v485_v32 }
  0x4e   : > { %v492_v36 = vadd.f32 %v491_v35, %v476_v34 }
  0x50   : > { %v493_v37 = vsel %vm477_vm11, %v475_v23, %v492_v36 }
  0x51   : > { %v495_v39 = vmul.f32 %v494_v38, %v493_v37 }
  0x53   : > { %v496_v41 = vadd.f32 %v495_v39, %v474_v40 }
  0x55   : > { %686 = vmatpush3.xpose.msk.msra.mxu1 %vm497_vm12, %v496_v41 }
 0x109   : > { %v469_v42 = vpop.f32.mrf.mxu0 }
 0x10a   : > { %v473_v43 = vmax.f32 %v469_v42, 0.0 }
 0x10b   : > { %v684_v44 = vpop.f32.mrf.mxu0 }
 0x10c   : > { %688 = vmatmul.mubr.msk.f32.vlgmr.msra.gmra.mxu1 %vm497_vm12, %v473_v43 }
 0x1cc   : > { %v570_v45 = vpop.f32.mrf.mxu1 }
 0x1cd   : > { %v663_v46 = vmul.f32 -1.442695, %v570_v45 }
 0x1ce   : > { %v689_v47 = vpop.f32.mrf.mxu1 }
 0x1cf   : > { %720 = vpow2.f32 %v663_v46 }
 0x1dc   : > { %v721_v48 = vpop.eup %720 }
 0x1dd   : > { %v577_v49 = vadd.f32 1.0, %v721_v48 }
 0x1df   : > { %722 = vrcp.f32 %v577_v49 }
 0x1ec   : > { %v723_v50 = vpop.eup %722 }
 0x1ed   : > { %581 = vst.msk [vmem:[%s293_s15] sm:$0xff] %vm580_vm13, %v723_v50 }
 0x1ee PF: > { %s17_s24 = sadd.s32 1, %s730_s24  }
 0x1ef   : > { %p14_p4 = scmp.ge.s32.totalorder %s17_s24, 6  }
 0x1f1   :  { %16 = sbr.rel (!%p14_p4) target bundleno = 1 (0x1), region = 81 }

</bundles_post_ra>
